<compile_context>
chip_gen: v6e
topology: v6e:2x2x1
jax: 0.10.0
libtpu: 0.0.40
codegen_flags: <defaults>
</compile_context>

<pallas_src>
import math
from functools import partial

import jax
import jax.numpy as jnp
from jax import lax
from jax.experimental import pallas as pl
from jax.experimental.pallas import tpu as pltpu


# ----------------------------------------------------------------------------
# Generation-aware sizing (v5e/v6e: 128 MiB VMEM, v7x: 64 MiB per TensorCore)
# ----------------------------------------------------------------------------
def _vmem_capacity_bytes():
    try:
        return int(pltpu.get_tpu_info().vmem_capacity_bytes)
    except Exception:
        return 128 * 1024 * 1024


_VMEM_CAP = _vmem_capacity_bytes()
_VMEM_LIMIT_BYTES = int(_VMEM_CAP * 3 // 4)                 # 96 MiB v5e/v6e, 48 MiB v7x
_TILE_TARGET_BYTES = max(2 * 1024 * 1024, _VMEM_LIMIT_BYTES // 24)
_WEIGHT_BUDGET_BYTES = _VMEM_LIMIT_BYTES // 6


def _round_up(x, m):
    return ((x + m - 1) // m) * m


def _row_tile(R, D, H, itemsize):
    """Row tile for the 'mode == last axis' form."""
    tm = (_TILE_TARGET_BYTES // (max(D, H) * itemsize)) // 16 * 16
    tm = max(16, min(tm, 4096))
    if R >= 32:
        # Guarantee >=2 grid programs (v7x has 2 TensorCores per chip).
        tm = min(tm, _round_up(pl.cdiv(R, 2), 16))
    return R if R <= tm else tm


def _lane_tile(B, D, H, itemsize, A):
    """Lane tile for the 'mode == interior axis' form."""
    tb = (_TILE_TARGET_BYTES // (max(D, H) * itemsize)) // 128 * 128
    tb = max(128, min(tb, 4096))
    if A == 1 and B >= 256:
        tb = min(tb, _round_up(pl.cdiv(B, 2), 128))          # >=2 programs
    return B if B <= tb else tb


def _h_tile(H, D, itemsize):
    """N-tile over the output-feature dim so resident weight blocks fit VMEM."""
    if H <= 128 or D * H * itemsize <= _WEIGHT_BUDGET_BYTES:
        return H
    th = max(128, (_WEIGHT_BUDGET_BYTES // (D * itemsize)) // 128 * 128)
    return min(th, H)


def _compiler_params(n_grid_axes):
    return pltpu.CompilerParams(
        dimension_semantics=("parallel",) * n_grid_axes,
        vmem_limit_bytes=_VMEM_LIMIT_BYTES)


def _weight_spec(shape, index_map, constant):
    """BlockSpec for weights/biases; constant-index blocks are single-buffered."""
    if constant:
        try:
            return pl.BlockSpec(shape, index_map, pipeline_mode=pl.Buffered(1))
        except Exception:        # pipeline_mode not available in this jax build
            pass
    return pl.BlockSpec(shape, index_map)


# ----------------------------------------------------------------------------
# Pallas kernels (plain linear: all gating is collapsed into the weights)
# ----------------------------------------------------------------------------
def _linear_last_kernel(x_ref, w_ref, b_ref, o_ref):
    # x (TM, D) @ w (D, TH) -> (TM, TH); f32 MXU accumulation; f32 bias add.
    o_ref[...] = (jnp.dot(x_ref[...], w_ref[...],
                          preferred_element_type=jnp.float32)
                  + b_ref[...]).astype(o_ref.dtype)


def _linear_mid_kernel(x_ref, wt_ref, b_ref, o_ref):
    # wt (TH, D) @ x (D, TB) -> (TH, TB); output lanes carry the large trailing
    # dim B -> lane-dense stores.
    o_ref[0] = (jnp.dot(wt_ref[...], x_ref[0],
                        preferred_element_type=jnp.float32)
                + b_ref[...]).astype(o_ref.dtype)


# ----------------------------------------------------------------------------
# pallas_call wrappers (tiling / grid / specs)
# ----------------------------------------------------------------------------
def _call_last(x2, w, b_row):
    """Mode axis is the last axis: x2 (R, D) @ w (D, H) -> (R, H)."""
    R, D = x2.shape
    H = w.shape[1]
    itemsize = jnp.dtype(x2.dtype).itemsize
    TM = _row_tile(R, D, H, itemsize)
    TH = _h_tile(H, D, itemsize)
    grid = (pl.cdiv(R, TM), pl.cdiv(H, TH))
    const_w = (TH == H)

    x_spec = pl.BlockSpec((TM, D), lambda i, j: (i, 0))
    w_spec = _weight_spec((D, TH), lambda i, j: (0, j), const_w)
    b_spec = _weight_spec((1, TH), lambda i, j: (0, j), const_w)
    o_spec = pl.BlockSpec((TM, TH), lambda i, j: (i, j))
    out_shape = jax.ShapeDtypeStruct((R, H), x2.dtype)
    ce = pl.CostEstimate(
        flops=2 * R * D * H, transcendentals=0,
        bytes_accessed=itemsize * (R * D + D * H + R * H) + 4 * H)
    return pl.pallas_call(
        _linear_last_kernel, out_shape=out_shape, grid=grid,
        in_specs=[x_spec, w_spec, b_spec], out_specs=o_spec,
        compiler_params=_compiler_params(len(grid)), cost_estimate=ce,
    )(x2, w, b_row)


def _call_mid(x3, wt, b_col):
    """Mode axis is an interior axis: x3 (A, D, B), wt (H, D) -> (A, H, B)."""
    A, D, B = x3.shape
    H = wt.shape[0]
    itemsize = jnp.dtype(x3.dtype).itemsize
    TB = _lane_tile(B, D, H, itemsize, A)
    TH = _h_tile(H, D, itemsize)
    grid = (A, pl.cdiv(H, TH), pl.cdiv(B, TB))
    const_w = (TH == H)

    x_spec = pl.BlockSpec((1, D, TB), lambda a, h, bb: (a, 0, bb))
    w_spec = _weight_spec((TH, D), lambda a, h, bb: (h, 0), const_w)
    b_spec = _weight_spec((TH, 1), lambda a, h, bb: (h, 0), const_w)
    o_spec = pl.BlockSpec((1, TH, TB), lambda a, h, bb: (a, h, bb))
    out_shape = jax.ShapeDtypeStruct((A, H, B), x3.dtype)
    ce = pl.CostEstimate(
        flops=2 * A * B * D * H, transcendentals=0,
        bytes_accessed=itemsize * (A * D * B + D * H + A * H * B) + 4 * H)
    return pl.pallas_call(
        _linear_mid_kernel, out_shape=out_shape, grid=grid,
        in_specs=[x_spec, w_spec, b_spec], out_specs=o_spec,
        compiler_params=_compiler_params(len(grid)), cost_estimate=ce,
    )(x3, wt, b_col)


def _apply_last(x, w, b, compute_dtype):
    """Apply (D,H) linear to the last axis of x."""
    D = x.shape[-1]
    H = w.shape[1]
    lead = x.shape[:-1]
    out2 = _call_last(x.reshape(-1, D), w.astype(compute_dtype),
                      b.astype(jnp.float32).reshape(1, H))
    return out2.reshape(lead + (H,))


def _apply_mid(x, axis, wt, b, compute_dtype):
    """Apply a linear (given pre-transposed wt (H,D)) to interior axis `axis`."""
    D = x.shape[axis]
    H = wt.shape[0]
    A = math.prod(x.shape[:axis])
    B = math.prod(x.shape[axis + 1:])
    out3 = _call_mid(x.reshape(A, D, B), wt.astype(compute_dtype),
                     b.astype(jnp.float32).reshape(H, 1))
    return out3.reshape(x.shape[:axis] + (H,) + x.shape[axis + 1:])


# ----------------------------------------------------------------------------
# Per-mode step (wrapper glue: gate MLP, weight select/blend; matmuls in Pallas)
# ----------------------------------------------------------------------------
def _mode_step(x, p, *, axis, apply_gating, gating_mode, compute_dtype):
    n_axes = x.ndim
    D = x.shape[axis]
    has_proj = "wp" in p
    is_last = (axis == n_axes - 1)

    # Weight in the orientation the kernel wants (pre-transposed at init for
    # interior modes, so no per-forward transpose materializes under jit).
    wa = p["wa"] if is_last else p.get("wat", p["wa"].T)
    wp = None
    if has_proj:
        wp = p["wp"] if is_last else p.get("wpt", p["wp"].T)

    def _linear(xv, w, b):
        if is_last:
            return _apply_last(xv, w, b, compute_dtype)
        return _apply_mid(xv, axis, w, b, compute_dtype)

    if not apply_gating:
        return _linear(x, wa, p["ba"])

    # Gate network (tiny, f32): the mean over every non-mode axis equals the
    # column mean of the flattened (R, D) view -> no transpose needed.
    # TODO(synk): fuse this full-tensor mean into the previous mode's kernel.
    red_axes = tuple(ax for ax in range(n_axes) if ax != axis)
    m = jnp.mean(x.astype(jnp.float32), axis=red_axes)                  # (D,)
    h = jnp.maximum(m @ p["w1"] + p["b1"], 0.0)
    g = jax.nn.sigmoid(h @ p["w2"] + p["b2"])[0]                        # f32 scalar

    if has_proj:
        # Projection path (D != H): the gate collapses into ONE matmul.
        if gating_mode == "hard":
            # lax.cond -> only the selected weight is ever read from HBM.
            w_eff, b_eff = lax.cond(g > 0.5,
                                    lambda: (wa, p["ba"]),
                                    lambda: (wp, p["bp"]))
        else:
            w_eff = g * wa + (1.0 - g) * wp          # exact pre-blend
            b_eff = g * p["ba"] + (1.0 - g) * p["bp"]
        return _linear(x, w_eff, b_eff)

    # True identity path (D == H).
    if gating_mode == "hard":
        # Hoisted decision: a closed gate skips the kernel, the weight DMA and
        # the full-tensor HBM round trip entirely.
        return lax.cond(g > 0.5,
                        lambda xv: _linear(xv, wa, p["ba"]),
                        lambda xv: xv,
                        x)

    # Soft identity gate: exact pre-blend into the weight -> plain linear kernel.
    #   g*(xW + b) + (1-g)*x == x @ (g*W + (1-g)*I) + g*b   (same in W^T form).
    eye = jnp.eye(D, dtype=jnp.float32)
    w_eff = g * wa + (1.0 - g) * eye
    b_eff = g * p["ba"]
    return _linear(x, w_eff, b_eff)


# ----------------------------------------------------------------------------
# Module forward
# ----------------------------------------------------------------------------
def nd_linear_gated_forward(x, params, *, transform_outer=True,
                            gating_mode="soft", gated_modes="all",
                            compute_dtype=jnp.bfloat16):
    if gated_modes == "topk":
        # TODO(synk): gated_modes == "topk" needs stateful first-batch mode
        #             selection (torch uses .item()); not implemented.
        raise NotImplementedError("gated_modes='topk' is not supported")
    in_dtype = x.dtype
    # bf16 activations between modes: halves HBM traffic and feeds the MXU its
    # fast input dtype; accumulation stays f32 inside the kernels.
    x = x.astype(compute_dtype)
    n = len(params)
    for i in range(n):
        if transform_outer:
            layer_idx, axis = i, i + 1
        else:
            layer_idx, axis = n - (i + 1), n - i
        apply_gating = (gated_modes == "all") or (gated_modes == "first" and i == 0)
        x = _mode_step(x, params[layer_idx], axis=axis, apply_gating=apply_gating,
                       gating_mode=gating_mode, compute_dtype=compute_dtype)
    return x.astype(in_dtype)


# ----------------------------------------------------------------------------
# Pure-JAX reference (mirror of the PyTorch forward, f32) for validation
# ----------------------------------------------------------------------------
def _ref_forward(x, params, *, transform_outer=True, gating_mode="soft",
                 gated_modes="all"):
    n = len(params)
    for i in range(n):
        layer_idx = i if transform_outer else n - (i + 1)
        axis = i + 1 if transform_outer else n - i
        apply_gating = (gated_modes == "all") or (gated_modes == "first" and i == 0)
        p = params[layer_idx]

        xt = jnp.swapaxes(x, axis, n)
        lead = xt.shape[:-1]
        xf = xt.reshape(-1, xt.shape[-1])
        t = xf @ p["wa"] + p["ba"]
        if apply_gating:
            red = tuple(ax for ax in range(x.ndim) if ax != axis)
            m = jnp.mean(x, axis=red)
            h = jnp.maximum(m @ p["w1"] + p["b1"], 0.0)
            g = jax.nn.sigmoid(h @ p["w2"] + p["b2"])[0]
            ident = xf @ p["wp"] + p["bp"] if "wp" in p else xf
            out = jnp.where(g > 0.5, t, ident) if gating_mode == "hard" \
                else g * t + (1.0 - g) * ident
        else:
            out = t
        x = jnp.swapaxes(out.reshape(lead + (out.shape[-1],)), axis, n)
    return x


# ----------------------------------------------------------------------------
# Deterministic parameter init (shapes from NdLinearGated.__init__)
# ----------------------------------------------------------------------------
def init_params(key, input_dims, hidden_size, gating_hidden_dim=16,
                gate_logit_shift=2.0):
    params = []
    for idx, (D, H) in enumerate(zip(input_dims, hidden_size)):
        key, *ks = jax.random.split(key, 9)
        # Shift the gate logit away from the 0.5 hard threshold (alternating
        # open/closed per layer) so hard-gating tests exercise a deterministic
        # branch that is robust to bf16 rounding of the gate mean.
        shift = gate_logit_shift if idx % 2 == 0 else -gate_logit_shift
        p = {
            "wa": 0.1 * jax.random.normal(ks[0], (D, H), jnp.float32),
            "ba": 0.1 * jax.random.normal(ks[1], (H,), jnp.float32),
            "w1": 0.1 * jax.random.normal(ks[2], (D, gating_hidden_dim), jnp.float32),
            "b1": 0.1 * jax.random.normal(ks[3], (gating_hidden_dim,), jnp.float32),
            "w2": 0.1 * jax.random.normal(ks[4], (gating_hidden_dim, 1), jnp.float32),
            "b2": 0.1 * jax.random.normal(ks[5], (1,), jnp.float32) + shift,
        }
        p["wat"] = p["wa"].T                 # cached (H, D) for interior-axis modes
        if D != H:  # identity_projections uses a Linear only when dims differ
            p["wp"] = 0.1 * jax.random.normal(ks[6], (D, H), jnp.float32)
            p["bp"] = 0.1 * jax.random.normal(ks[7], (H,), jnp.float32)
            p["wpt"] = p["wp"].T
        params.append(p)
    return params


def _run_case(name, x, params, *, transform_outer, gating_mode, gated_modes,
              compute_dtype, tol):
    fwd = jax.jit(partial(nd_linear_gated_forward, transform_outer=transform_outer,
                          gating_mode=gating_mode, gated_modes=gated_modes,
                          compute_dtype=compute_dtype))
    out = jax.block_until_ready(fwd(x, params))
    ref = jax.block_until_ready(_ref_forward(x, params,
                                             transform_outer=transform_outer,
                                             gating_mode=gating_mode,
                                             gated_modes=gated_modes))
    assert out.shape == ref.shape and out.dtype == ref.dtype, (name, out.shape, ref.shape)
    err = float(jnp.max(jnp.abs(out - ref)))
    assert err <= tol, (name, err, tol)


if __name__ == "__main__":
    key = jax.random.PRNGKey(0)
    batch = 2
    cases = [
        # (input_dims, hidden_size, transform_outer, gating_mode, gated_modes,
        #  compute_dtype, tolerance)
        ((16, 32), (32, 32), True, "soft", "all", jnp.bfloat16, 3e-2),   # proj pre-blend + id pre-blend, bf16
        ((16, 32), (16, 32), True, "soft", "all", jnp.float32, 2e-3),    # f32 precision path
        ((16, 32), (16, 32), True, "hard", "all", jnp.bfloat16, 3e-2),   # hard id gate: open + closed (lax.cond)
        ((8, 16, 32), (8, 32, 64), False, "hard", "first", jnp.bfloat16, 3e-2),  # inner->outer, hard weight select
    ]
    for idx, (idims, hdims, outer, gmode, gmodes, cdt, tol) in enumerate(cases):
        key, kx, kp = jax.random.split(key, 3)
        x = jax.random.normal(kx, (batch,) + idims, jnp.float32)
        params = init_params(kp, idims, hdims, gating_hidden_dim=16)
        _run_case(f"case{idx}", x, params, transform_outer=outer, gating_mode=gmode,
                  gated_modes=gmodes, compute_dtype=cdt, tol=tol)

    print("KERNEL_OK")
</pallas_src>

<mosaic_0001>
module attributes {stable_mosaic.version = 11 : i64} {
  func.func @_linear_mid_kernel(%arg0: i32, %arg1: i32, %arg2: i32, %arg3: memref<1x16x32xbf16, #tpu.memory_space<vmem>>, %arg4: memref<32x16xbf16, #tpu.memory_space<vmem>>, %arg5: memref<32x1xf32, #tpu.memory_space<vmem>>, %arg6: memref<1x32x32xbf16, #tpu.memory_space<vmem>>) attributes {dimension_semantics = [#tpu.dimension_semantics<parallel>, #tpu.dimension_semantics<parallel>, #tpu.dimension_semantics<parallel>], iteration_bounds = array<i64: 2, 1, 1>, scalar_prefetch = 0 : i64, scratch_operands = 0 : i64, tpu.core_type = #tpu.core_type<tc>, window_params = [{transform_indices = @transform_0, window_bounds = array<i64: 1, 16, 32>}, {pipeline_mode = #tpu.pipeline_mode<synchronous>, transform_indices = @transform_1, window_bounds = array<i64: 32, 16>}, {pipeline_mode = #tpu.pipeline_mode<synchronous>, transform_indices = @transform_2, window_bounds = array<i64: 32, 1>}, {transform_indices = @transform_3, window_bounds = array<i64: 1, 32, 32>}]} {
    %c0 = arith.constant 0 : index
    %c0_0 = arith.constant 0 : index
    %0 = vector.load %arg4[%c0, %c0_0] : memref<32x16xbf16, #tpu.memory_space<vmem>>, vector<32x16xbf16>
    %c0_1 = arith.constant 0 : index
    %c0_2 = arith.constant 0 : index
    %c0_3 = arith.constant 0 : index
    %1 = vector.load %arg3[%c0_1, %c0_2, %c0_3] : memref<1x16x32xbf16, #tpu.memory_space<vmem>>, vector<1x16x32xbf16>
    %2 = vector.shape_cast %1 : vector<1x16x32xbf16> to vector<16x32xbf16>
    %cst = arith.constant dense<0.000000e+00> : vector<32x32xf32>
    %3 = tpu.matmul %0, %2, %cst {dimension_numbers = #tpu.dot_dimension_numbers<[1], [0], [0], [1], [0, 0, 1, 1], [], []>} : vector<32x16xbf16>, vector<16x32xbf16>, vector<32x32xf32> -> vector<32x32xf32>
    %c0_4 = arith.constant 0 : index
    %c0_5 = arith.constant 0 : index
    %4 = vector.load %arg5[%c0_4, %c0_5] : memref<32x1xf32, #tpu.memory_space<vmem>>, vector<32x1xf32>
    %5 = vector.broadcast %4 : vector<32x1xf32> to vector<32x32xf32>
    %6 = arith.addf %3, %5 : vector<32x32xf32>
    %7 = arith.truncf %6 : vector<32x32xf32> to vector<32x32xbf16>
    %c0_6 = arith.constant 0 : index
    %c0_7 = arith.constant 0 : index
    %c0_8 = arith.constant 0 : index
    %8 = vector.load %arg6[%c0_6, %c0_7, %c0_8] : memref<1x32x32xbf16, #tpu.memory_space<vmem>>, vector<1x32x32xbf16>
    %9 = vector.shape_cast %8 : vector<1x32x32xbf16> to vector<32x32xbf16>
    %10 = vector.shape_cast %7 : vector<32x32xbf16> to vector<1x32x32xbf16>
    tpu.vector_store %arg6[%c0_6, %c0_7, %c0_8], %10 {strides = array<i32>} : memref<1x32x32xbf16, #tpu.memory_space<vmem>>, vector<1x32x32xbf16>,
    return
  }
  func.func @transform_0(%arg0: i32, %arg1: i32, %arg2: i32) -> (i32, i32, i32) {
    %c0_i32 = arith.constant 0 : i32
    %c0_i32_0 = arith.constant 0 : i32
    return %arg0, %c0_i32, %arg2 : i32, i32, i32
  }
  func.func @transform_1(%arg0: i32, %arg1: i32, %arg2: i32) -> (i32, i32) {
    %c0_i32 = arith.constant 0 : i32
    %c0_i32_0 = arith.constant 0 : i32
    return %arg1, %c0_i32 : i32, i32
  }
  func.func @transform_2(%arg0: i32, %arg1: i32, %arg2: i32) -> (i32, i32) {
    %c0_i32 = arith.constant 0 : i32
    %c0_i32_0 = arith.constant 0 : i32
    return %arg1, %c0_i32 : i32, i32
  }
  func.func @transform_3(%arg0: i32, %arg1: i32, %arg2: i32) -> (i32, i32, i32) {
    %c0_i32 = arith.constant 0 : i32
    return %arg0, %arg1, %arg2 : i32, i32, i32
  }
}

module attributes {stable_mosaic.version = 11 : i64} {
  func.func @_linear_last_kernel(%arg0: i32, %arg1: i32, %arg2: memref<32x32xbf16, #tpu.memory_space<vmem>>, %arg3: memref<32x32xbf16, #tpu.memory_space<vmem>>, %arg4: memref<1x32xf32, #tpu.memory_space<vmem>>, %arg5: memref<32x32xbf16, #tpu.memory_space<vmem>>) attributes {dimension_semantics = [#tpu.dimension_semantics<parallel>, #tpu.dimension_semantics<parallel>], iteration_bounds = array<i64: 2, 1>, scalar_prefetch = 0 : i64, scratch_operands = 0 : i64, tpu.core_type = #tpu.core_type<tc>, window_params = [{transform_indices = @transform_0, window_bounds = array<i64: 32, 32>}, {pipeline_mode = #tpu.pipeline_mode<synchronous>, transform_indices = @transform_1, window_bounds = array<i64: 32, 32>}, {pipeline_mode = #tpu.pipeline_mode<synchronous>, transform_indices = @transform_2, window_bounds = array<i64: 1, 32>}, {transform_indices = @transform_3, window_bounds = array<i64: 32, 32>}]} {
    %c0 = arith.constant 0 : index
    %c0_0 = arith.constant 0 : index
    %0 = vector.load %arg2[%c0, %c0_0] : memref<32x32xbf16, #tpu.memory_space<vmem>>, vector<32x32xbf16>
    %c0_1 = arith.constant 0 : index
    %c0_2 = arith.constant 0 : index
    %1 = vector.load %arg3[%c0_1, %c0_2] : memref<32x32xbf16, #tpu.memory_space<vmem>>, vector<32x32xbf16>
    %cst = arith.constant dense<0.000000e+00> : vector<32x32xf32>
    %2 = tpu.matmul %0, %1, %cst {dimension_numbers = #tpu.dot_dimension_numbers<[1], [0], [0], [1], [0, 0, 1, 1], [], []>} : vector<32x32xbf16>, vector<32x32xbf16>, vector<32x32xf32> -> vector<32x32xf32>
    %c0_3 = arith.constant 0 : index
    %c0_4 = arith.constant 0 : index
    %3 = vector.load %arg4[%c0_3, %c0_4] : memref<1x32xf32, #tpu.memory_space<vmem>>, vector<1x32xf32>
    %4 = vector.broadcast %3 : vector<1x32xf32> to vector<32x32xf32>
    %5 = arith.addf %2, %4 : vector<32x32xf32>
    %6 = arith.truncf %5 : vector<32x32xf32> to vector<32x32xbf16>
    %c0_5 = arith.constant 0 : index
    %c0_6 = arith.constant 0 : index
    %7 = vector.load %arg5[%c0_5, %c0_6] : memref<32x32xbf16, #tpu.memory_space<vmem>>, vector<32x32xbf16>
    tpu.vector_store %arg5[%c0_5, %c0_6], %6 {strides = array<i32>} : memref<32x32xbf16, #tpu.memory_space<vmem>>, vector<32x32xbf16>,
    return
  }
  func.func @transform_0(%arg0: i32, %arg1: i32) -> (i32, i32) {
    %c0_i32 = arith.constant 0 : i32
    %c0_i32_0 = arith.constant 0 : i32
    return %arg0, %c0_i32 : i32, i32
  }
  func.func @transform_1(%arg0: i32, %arg1: i32) -> (i32, i32) {
    %c0_i32 = arith.constant 0 : i32
    %c0_i32_0 = arith.constant 0 : i32
    return %c0_i32, %arg1 : i32, i32
  }
  func.func @transform_2(%arg0: i32, %arg1: i32) -> (i32, i32) {
    %c0_i32 = arith.constant 0 : i32
    %c0_i32_0 = arith.constant 0 : i32
    return %c0_i32, %arg1 : i32, i32
  }
  func.func @transform_3(%arg0: i32, %arg1: i32) -> (i32, i32) {
    %c0_i32 = arith.constant 0 : i32
    return %arg0, %arg1 : i32, i32
  }
}

</mosaic_0001>

<bundles_post_ra>
// kernel: nd_linear_gated_forward.3
= control target key start
LH: loop header
LB: loop body
LE: loop exit
PB: predicated region body
PF: predicated region fallthrough
CT: control target
= control target key end

     0   :  { %s554_s12 = smov 0   ;;  %s556_s13 = smov 0   ;;  %s596_s0 = inlined_call_operand.vmem [shape: bf16[64,32], index: 0, kind: input, shape index: {}]   ;;  %s597_s1 = inlined_call_operand.vmem [shape: bf16[32,32], index: 1, kind: input, shape index: {}]   ;;  %s598_s2 = inlined_call_operand.vmem [shape: f32[1,32], index: 2, kind: input, shape index: {}]   ;;  %s599_s3 = inlined_call_operand.vmem [shape: bf16[64,32], index: 3, kind: output, shape index: {}]  }
   0x1   :  { %s558_s14 = smov 0  }
   0x2 LB: > { %s25_s15 = sadd.s32 1, %s528_s13  ;;  %p448_p0 = scmp.ge.s32.totalorder %s532_s14, 1  ;;  %s532_s14 = sphi %s558_s14, %s13_s14   ;;  %s528_s13 = sphi %s556_s13, %s601_s13   ;;  %s524_s12 = sphi %s554_s12, %s600_s12  }
   0x3   : > { %p27_p1 = scmp.ge.s32.totalorder %s25_s15, 2  ;;  %p169_p2 = scmp.lt.s32.totalorder %s532_s14, 3 }
   0x5   : > { %s603_s15 = smov (%p27_p1, %s25_s15), 0  ;;  %p170_p3 = pnand %p448_p0, %p169_p2 }
   0x6   : > { %s449_s18 = sshll.u32 (!%p170_p3), %s524_s12, 2 }
   0x7   : > { %173 = sbr.rel (%p170_p3) target bundleno = 225 (0xe1), region = 32  ;;  %p204_p4 = scmp.lt.s32.totalorder (!%p170_p3), %s449_s18, 7 }
   0xc   : > { %v506_v0 = vld [vmem:[%s597_s1 + $0x8] sm:$0xff]   ;;  %v507_v1 = vld [vmem:[%s597_s1] sm:$0xff]   ;;  %s605_s18 = smov (!%p204_p4, %s449_s18), 7  ;;  %vm263_vm0 = vcmask 261120   ;;  %vm335_vm1 = vcmask 257024  }
   0xd   : > { %474 = vmatprep.subr.bf16.mxu0 %v506_v0  ;;  %s450_s21 = sshll.u32 %s605_s18, 2  ;;  %v453_v5 = vld [vmem:[%s598_s2] ss:$0 sm:$0xff] }
   0xe   : > { %475 = vmatpush3.bf16.msra.mxu0 %v506_v0  ;;  %s207_s24 = scalar_lea.vmem %s596_s0, %s450_s21  ;;  %s223_s29 = scalar_lea.vmem %s599_s3, %s450_s21 }
   0xf   : > { %476 = vmatprep.subr.bf16.mxu0 %v507_v1  ;;  %v508_v2 = vld [vmem:[%s207_s24] sm:$0xff]   ;;  %v509_v3 = vld [vmem:[%s207_s24 + $0x8] sm:$0xff]  }
  0x10   : > { %478 = vmatprep.mubr.msk.bf16.mxu0 %vm263_vm0, %v508_v2 }
  0x12   : > { %477 = vmatpush3.bf16.msra.mxu0 %v507_v1 }
  0x15   : > { %479 = vmatmul.mubr.msk.bf16.vlgmr.msra.gmra.mxu0 %vm263_vm0, %v509_v3 }
  0xd5   : > { %v480_v4 = vpop.f32.mrf.mxu0 }
  0xd6   : > { %v313_v10 = vadd.f32 %v480_v4, %v453_v5 }
  0xd7   : > { %v304_v6 = vpop.f32.mrf.mxu0 }
  0xd8   : > { %v305_v7 = vadd.f32 %v453_v5, %v304_v6  ;;  %v468_v15 = vpack.c.bf16 %v313_v10, %v313_v10 }
  0xd9   : > { %v481_v8 = vpop.f32.mrf.mxu0 }
  0xda   : > { %v466_v9 = vpack.c.bf16 %v305_v7, %v305_v7  ;;  %v316_v12 = vadd.f32 %v481_v8, %v453_v5  ;;  %338 = vst.msk [vmem:[%s223_s29 + $0x8] sm:$0xf] %vm335_vm1, %v468_v15 }
  0xdb   : > { %v307_v11 = vpop.f32.mrf.mxu0 }
  0xdc   : > { %336 = vst.msk [vmem:[%s223_s29] sm:$0xf] %vm335_vm1, %v466_v9  ;;  %v308_v13 = vadd.f32 %v453_v5, %v307_v11  ;;  %v469_v16 = vpack.c.bf16 %v316_v12, %v316_v12 }
  0xde   : > { %v467_v14 = vpack.c.bf16 %v308_v13, %v308_v13  ;;  %339 = vst.msk [vmem:[%s223_s29 + $0xc] sm:$0xf] %vm335_vm1, %v469_v16 }
  0xe0   : > { %337 = vst.msk [vmem:[%s223_s29 + $0x4] sm:$0xf] %vm335_vm1, %v467_v14 }
  0xe1 PF: > { %s13_s14 = sadd.s32 1, %s532_s14   ;;  %s600_s12 = smov %s528_s13 }
  0xe2   : > { %p10_p5 = scmp.ge.s32.totalorder %s13_s14, 4   ;;  %s601_s13 = smov %s603_s15 }
  0xe4   :  { %12 = sbr.rel (!%p10_p5) target bundleno = 2 (0x2), region = 68 }

// kernel: nd_linear_gated_forward.2
= control target key start
LH: loop header
LB: loop body
LE: loop exit
PB: predicated region body
PF: predicated region fallthrough
CT: control target
= control target key end

     0   :  { %s630_s12 = smov 0   ;;  %s632_s13 = smov 0   ;;  %s687_s0 = inlined_call_operand.vmem [shape: bf16[2,16,32], index: 0, kind: input, shape index: {}]   ;;  %s688_s1 = inlined_call_operand.vmem [shape: bf16[32,16], index: 1, kind: input, shape index: {}]   ;;  %s689_s2 = inlined_call_operand.vmem [shape: f32[32,1], index: 2, kind: input, shape index: {}]   ;;  %s690_s3 = inlined_call_operand.vmem [shape: bf16[2,32,32], index: 3, kind: output, shape index: {}]  }
   0x1   :  { %s634_s14 = smov 0  }
   0x2 LB: > { %s32_s15 = sadd.s32 1, %s603_s13  ;;  %p524_p0 = scmp.ge.s32.totalorder %s607_s14, 1  ;;  %s607_s14 = sphi %s634_s14, %s13_s14   ;;  %s603_s13 = sphi %s632_s13, %s692_s13   ;;  %s599_s12 = sphi %s630_s12, %s691_s12  }
   0x3   : > { %p34_p1 = scmp.ge.s32.totalorder %s32_s15, 2  ;;  %p187_p2 = scmp.lt.s32.totalorder %s607_s14, 3 }
   0x5   : > { %s694_s15 = smov (%p34_p1, %s32_s15), 0  ;;  %p188_p3 = pnand %p524_p0, %p187_p2 }
   0x6   : > { %p231_p4 = scmp.lt.s32.totalorder (!%p188_p3), %s599_s12, 1 }
   0x7   : > { %191 = sbr.rel (%p188_p3) target bundleno = 224 (0xe0), region = 32 }
   0xc   : > { %v583_v0 = vld [vmem:[%s688_s1] sm:$0xff]   ;;  %vm311_vm0 = vcmask 130048   ;;  %s696_s12 = smov (!%p231_p4, %s599_s12), 1  ;;  %v273_v1 = vld [vmem:[%s689_s2 + $0x10] sm:$0xff]  ;;  %v609_v3 = vmov 0   ;;  %v274_v4 = vld [vmem:[%s689_s2 + $0x18] sm:$0xff] }
   0xd   : > { %551 = vmatprep.mubr.msk.bf16.mxu0 %vm311_vm0, %v583_v0  ;;  %v271_v2 = vld [vmem:[%s689_s2] sm:$0xff]  ;;  %581 = vset.pattern.permute.xlu1 %v609_v3  ;;  %s540_s22 = sshll.u32 %s696_s12, 3  ;;  %v272_v5 = vld [vmem:[%s689_s2 + $0x8] sm:$0xff]  ;;  %s541_s5 = sshll.u32 %s696_s12, 4  ;;  %vm383_vm1 = vcmask 257024  }
   0xe   : > { %580 = vset.pattern.permute.xlu0 %v609_v3  ;;  %287 = vperm.xlu1 %581, %v273_v1   ;;  %s238_s25 = scalar_lea.vmem %s687_s0, %s540_s22  ;;  %v584_v7 = vld [vmem:[%s688_s1 + $0x8] sm:$0xff]   ;;  %s262_s8 = scalar_lea.vmem %s690_s3, %s541_s5 }
   0xf   : > { %277 = vperm.xlu0 %580, %v271_v2   ;;  %v582_v6 = vld [vmem:[%s238_s25] sm:$0xff]  }
  0x10   : > { %549 = vmatprep.subr.bf16.mxu0 %v582_v6 }
  0x11   : > { %550 = vmatpush3.bf16.msra.mxu0 %v582_v6 }
  0x12   : > { %292 = vperm.xlu1 %581, %v274_v4  }
  0x13   : > { %282 = vperm.xlu0 %580, %v272_v5  }
  0x14   : > { %552 = vmatmul.mubr.msk.bf16.vlgmr.msra.gmra.mxu0 %vm311_vm0, %v584_v7 }
  0x89   : > { %v288_v8 = vpop.permute.xlu1 %287 }
  0x8a   : > { %v278_v9 = vpop.permute.xlu0 %277 }
  0x8d   : > { %v293_v15 = vpop.permute.xlu1 %292 }
  0x8e   : > { %v283_v19 = vpop.permute.xlu0 %282 }
  0xd4   : > { %v553_v10 = vpop.f32.mrf.mxu0 }
  0xd5   : > { %v361_v11 = vadd.f32 %v553_v10, %v288_v8 }
  0xd6   : > { %v352_v12 = vpop.f32.mrf.mxu0 }
  0xd7   : > { %v544_v13 = vpack.c.bf16 %v361_v11, %v361_v11  ;;  %v353_v14 = vadd.f32 %v352_v12, %v278_v9 }
  0xd8   : > { %v554_v16 = vpop.f32.mrf.mxu0 }
  0xd9   : > { %386 = vst.msk [vmem:[%s262_s8 + $0x8] sm:$0xf] %vm383_vm1, %v544_v13  ;;  %v542_v17 = vpack.c.bf16 %v353_v14, %v353_v14  ;;  %v364_v18 = vadd.f32 %v554_v16, %v293_v15 }
  0xda   : > { %v355_v20 = vpop.f32.mrf.mxu0 }
  0xdb   : > { %384 = vst.msk [vmem:[%s262_s8] sm:$0xf] %vm383_vm1, %v542_v17  ;;  %v545_v21 = vpack.c.bf16 %v364_v18, %v364_v18  ;;  %v356_v22 = vadd.f32 %v355_v20, %v283_v19 }
  0xdd   : > { %387 = vst.msk [vmem:[%s262_s8 + $0xc] sm:$0xf] %vm383_vm1, %v545_v21  ;;  %v543_v23 = vpack.c.bf16 %v356_v22, %v356_v22 }
  0xdf   : > { %385 = vst.msk [vmem:[%s262_s8 + $0x4] sm:$0xf] %vm383_vm1, %v543_v23 }
  0xe0 PF: > { %s13_s14 = sadd.s32 1, %s607_s14   ;;  %s691_s12 = smov %s603_s13 }
  0xe1   : > { %p10_p5 = scmp.ge.s32.totalorder %s13_s14, 4   ;;  %s692_s13 = smov %s694_s15 }
  0xe3   :  { %12 = sbr.rel (!%p10_p5) target bundleno = 2 (0x2), region = 68 }

</bundles_post_ra>
